<compile_context>
chip_gen: v5e
topology: v5e:2x2
jax: 0.10.0
libtpu: 0.0.40
codegen_flags: <defaults>
</compile_context>

<pallas_src>
import jax
import jax.numpy as jnp
from jax.experimental import pallas as pl
from jax.experimental.pallas import tpu as pltpu


def highway_kernel(x_ref, w_ref, b_ref, o_ref):
    E = o_ref.shape[-1]

    x_orig = x_ref[...]                               # (tb, E), input dtype
    x_mm = x_orig.astype(w_ref.dtype)                 # bf16 operand for the MXU

    # Single fused matmul: (tb, E) @ (E, 2E) -> (tb, 2E), f32 accumulation.
    fused = jnp.dot(x_mm, w_ref[...], preferred_element_type=jnp.float32)
    fused = fused + b_ref[...]                        # bias kept in f32

    # Split fused result: first E lanes -> proj, last E lanes -> gate.
    proj = jnp.maximum(fused[:, :E], 0.0)             # relu(x @ Wp + bp)
    gate = jax.nn.sigmoid(fused[:, E:])               # sigmoid(x @ Wg + bg)

    # gate*proj + (1-gate)*x  ==  x + gate*(proj - x)   (one fewer VALU op)
    x_f32 = x_orig.astype(jnp.float32)
    o_ref[...] = (x_f32 + gate * (proj - x_f32)).astype(o_ref.dtype)


def prepare_highway_params(w_proj, b_proj, w_gate, b_gate,
                           matmul_dtype=jnp.bfloat16):
    """One-time parameter prep (call once, not per forward).

    w_*: (E, E) PyTorch-layout (out, in).  b_*: (E,).
    Returns (w_fused, b_fused): (E, 2E) matmul_dtype and (1, 2E) f32.
    """
    E = w_proj.shape[0]
    assert E % 128 == 0, "e_word must be a multiple of 128 (lane width)"
    w_fused = jnp.concatenate(
        [jnp.asarray(w_proj).T, jnp.asarray(w_gate).T], axis=1
    ).astype(matmul_dtype)                                        # (E, 2E)
    b_fused = jnp.concatenate(
        [jnp.asarray(b_proj), jnp.asarray(b_gate)]
    ).reshape(1, 2 * E).astype(jnp.float32)                       # (1, 2E)
    return w_fused, b_fused


def _round_up(n, m):
    return ((n + m - 1) // m) * m


def highway_forward(x, w_fused, b_fused, *, tb=512):
    """x: (B, E).  w_fused: (E, 2E).  b_fused: (1, 2E) f32.  Output dtype = x dtype."""
    B, E = x.shape
    assert w_fused.shape == (E, 2 * E)
    assert b_fused.shape == (1, 2 * E)
    assert E % 128 == 0, "e_word must be a multiple of 128 (lane width)"

    # ---- batch tile selection ------------------------------------------
    tb = max(8, (tb // 8) * 8)           # f32 sublane multiple
    tb = min(tb, _round_up(B, 8))        # never larger than the rounded batch
    # v7x has 2 TensorCores: if the grid would have <= 2 (possibly lopsided)
    # steps, rebalance tb to ~B/2 so both cores get equal work.
    if pl.cdiv(B, tb) <= 2:
        tb = min(tb, max(8, _round_up(pl.cdiv(B, 2), 8)))

    grid = (pl.cdiv(B, tb),)             # ragged last block: masked by Pallas

    # ---- VMEM budget (generation-aware) --------------------------------
    itemsize = x.dtype.itemsize
    w_itemsize = jnp.dtype(w_fused.dtype).itemsize
    budget = (
        2 * tb * E * itemsize            # x tile, double-buffered
        + 2 * tb * E * itemsize          # out tile, double-buffered
        + 2 * E * (2 * E) * w_itemsize   # fused weights (2 bufs, fetched once)
        + 2 * (2 * E) * 4                # fused bias
    )
    try:
        phys = pltpu.get_tpu_info().vmem_capacity_bytes
    except Exception:
        phys = 64 << 20                  # conservative default: v7x per-TC VMEM
    cap = int(phys * 0.8)                # leave headroom for Mosaic scratch
    vmem_limit = None
    # v5e's default scoped limit is 16 MiB (v6e/v7x: 32 MiB) -> use the smaller
    # value as the trigger so the override is generation-safe.
    if budget + (4 << 20) > (16 << 20):
        vmem_limit = min(budget + (8 << 20), cap)

    out = pl.pallas_call(
        highway_kernel,
        out_shape=jax.ShapeDtypeStruct((B, E), x.dtype),
        grid_spec=pltpu.PrefetchScalarGridSpec(
            num_scalar_prefetch=0,
            grid=grid,
            in_specs=[
                pl.BlockSpec((tb, E), lambda i: (i, 0)),       # x tile
                pl.BlockSpec((E, 2 * E), lambda i: (0, 0)),    # fused weights
                pl.BlockSpec((1, 2 * E), lambda i: (0, 0)),    # fused bias
            ],
            out_specs=pl.BlockSpec((tb, E), lambda i: (i, 0)),
        ),
        compiler_params=pltpu.CompilerParams(
            dimension_semantics=("parallel",),
            vmem_limit_bytes=vmem_limit,
        ),
    )(x, w_fused, b_fused)

    return out


def highway_reference(x, w_proj, b_proj, w_gate, b_gate):
    proj = jax.nn.relu(x @ w_proj.T + b_proj)
    gate = jax.nn.sigmoid(x @ w_gate.T + b_gate)
    return gate * proj + (1.0 - gate) * x


if __name__ == "__main__":
    e_word = 128    # word-embedding size (lane-aligned)
    batch = 52      # not a tile multiple -> exercises the ragged last block

    key = jax.random.PRNGKey(0)
    kx, kwp, kbp, kwg, kbg = jax.random.split(key, 5)

    x = jax.random.normal(kx, (batch, e_word), dtype=jnp.float32)
    # PyTorch Linear layout: weight (out, in), bias (out,)
    w_proj = jax.random.normal(kwp, (e_word, e_word), dtype=jnp.float32) * 0.05
    b_proj = jax.random.normal(kbp, (e_word,), dtype=jnp.float32) * 0.05
    w_gate = jax.random.normal(kwg, (e_word, e_word), dtype=jnp.float32) * 0.05
    b_gate = jax.random.normal(kbg, (e_word,), dtype=jnp.float32) * 0.05

    # One-time parameter prep (transpose + fuse + bf16 cast), hoisted out of
    # the forward path.
    w_fused, b_fused = prepare_highway_params(w_proj, b_proj, w_gate, b_gate)

    out = highway_forward(x, w_fused, b_fused)
    out = jax.block_until_ready(out)

    ref = highway_reference(x, w_proj, b_proj, w_gate, b_gate)
    assert out.shape == (batch, e_word)
    # bf16 matmul operands (f32 accumulation) -> loosened tolerance.
    assert jnp.allclose(out, ref, atol=2e-2, rtol=2e-2), "mismatch vs reference"

    print("KERNEL_OK")
</pallas_src>

<mosaic_0001>
module attributes {stable_mosaic.version = 11 : i64} {
  func.func @highway_kernel(%arg0: i32, %arg1: memref<32x128xf32, #tpu.memory_space<vmem>>, %arg2: memref<128x256xbf16, #tpu.memory_space<vmem>>, %arg3: memref<1x256xf32, #tpu.memory_space<vmem>>, %arg4: memref<32x128xf32, #tpu.memory_space<vmem>>) attributes {dimension_semantics = [#tpu.dimension_semantics<parallel>], iteration_bounds = array<i64: 2>, scalar_prefetch = 0 : i64, scratch_operands = 0 : i64, tpu.core_type = #tpu.core_type<tc>, window_params = [{transform_indices = @transform_0, window_bounds = array<i64: 32, 128>}, {pipeline_mode = #tpu.pipeline_mode<synchronous>, transform_indices = @transform_1, window_bounds = array<i64: 128, 256>}, {pipeline_mode = #tpu.pipeline_mode<synchronous>, transform_indices = @transform_2, window_bounds = array<i64: 1, 256>}, {transform_indices = @transform_3, window_bounds = array<i64: 32, 128>}]} {
    %c0 = arith.constant 0 : index
    %c0_0 = arith.constant 0 : index
    %0 = vector.load %arg1[%c0, %c0_0] : memref<32x128xf32, #tpu.memory_space<vmem>>, vector<32x128xf32>
    %1 = arith.truncf %0 : vector<32x128xf32> to vector<32x128xbf16>
    %c0_1 = arith.constant 0 : index
    %c0_2 = arith.constant 0 : index
    %2 = vector.load %arg2[%c0_1, %c0_2] : memref<128x256xbf16, #tpu.memory_space<vmem>>, vector<128x256xbf16>
    %cst = arith.constant dense<0.000000e+00> : vector<32x256xf32>
    %3 = tpu.matmul %1, %2, %cst {dimension_numbers = #tpu.dot_dimension_numbers<[1], [0], [0], [1], [0, 0, 1, 1], [], []>} : vector<32x128xbf16>, vector<128x256xbf16>, vector<32x256xf32> -> vector<32x256xf32>
    %c0_3 = arith.constant 0 : index
    %c0_4 = arith.constant 0 : index
    %4 = vector.load %arg3[%c0_3, %c0_4] : memref<1x256xf32, #tpu.memory_space<vmem>>, vector<1x256xf32>
    %5 = vector.broadcast %4 : vector<1x256xf32> to vector<32x256xf32>
    %6 = arith.addf %3, %5 : vector<32x256xf32>
    %7 = vector.extract_strided_slice %6 {offsets = [0, 0], sizes = [32, 128], strides = [1, 1]} : vector<32x256xf32> to vector<32x128xf32>
    %cst_5 = arith.constant 0.000000e+00 : f32
    %8 = vector.broadcast %cst_5 : f32 to vector<32x128xf32>
    %9 = arith.maximumf %7, %8 : vector<32x128xf32>
    %10 = vector.extract_strided_slice %6 {offsets = [0, 128], sizes = [32, 128], strides = [1, 1]} : vector<32x256xf32> to vector<32x128xf32>
    %11 = arith.negf %10 : vector<32x128xf32>
    %12 = math.exp %11 : vector<32x128xf32>
    %cst_6 = arith.constant 1.000000e+00 : f32
    %13 = vector.broadcast %cst_6 : f32 to vector<32x128xf32>
    %14 = arith.addf %13, %12 : vector<32x128xf32>
    %15 = arith.divf %13, %14 : vector<32x128xf32>
    %16 = arith.subf %9, %0 : vector<32x128xf32>
    %17 = arith.mulf %15, %16 : vector<32x128xf32>
    %18 = arith.addf %0, %17 : vector<32x128xf32>
    %c0_7 = arith.constant 0 : index
    %c0_8 = arith.constant 0 : index
    %19 = vector.load %arg4[%c0_7, %c0_8] : memref<32x128xf32, #tpu.memory_space<vmem>>, vector<32x128xf32>
    tpu.vector_store %arg4[%c0_7, %c0_8], %18 {strides = array<i32>} : memref<32x128xf32, #tpu.memory_space<vmem>>, vector<32x128xf32>,
    return
  }
  func.func @transform_0(%arg0: i32) -> (i32, i32) {
    %c0_i32 = arith.constant 0 : i32
    %c0_i32_0 = arith.constant 0 : i32
    return %arg0, %c0_i32 : i32, i32
  }
  func.func @transform_1(%arg0: i32) -> (i32, i32) {
    %c0_i32 = arith.constant 0 : i32
    %c0_i32_0 = arith.constant 0 : i32
    %c0_i32_1 = arith.constant 0 : i32
    return %c0_i32, %c0_i32_0 : i32, i32
  }
  func.func @transform_2(%arg0: i32) -> (i32, i32) {
    %c0_i32 = arith.constant 0 : i32
    %c0_i32_0 = arith.constant 0 : i32
    %c0_i32_1 = arith.constant 0 : i32
    return %c0_i32, %c0_i32_0 : i32, i32
  }
  func.func @transform_3(%arg0: i32) -> (i32, i32) {
    %c0_i32 = arith.constant 0 : i32
    %c0_i32_0 = arith.constant 0 : i32
    return %arg0, %c0_i32 : i32, i32
  }
}

</mosaic_0001>

<bundles_post_ra>
// kernel: tpu_custom_call.1
= control target key start
LH: loop header
LB: loop body
LE: loop exit
PB: predicated region body
PF: predicated region fallthrough
CT: control target
= control target key end

     0   :  { %8 = vsyncpa [#allocation3], 0  ;;  %s1270_s0 = inlined_call_operand.hbm [shape: f32[52,128], index: 0, kind: input, shape index: {}]   ;;  %s1271_s1 = inlined_call_operand.hbm [shape: bf16[128,256], index: 1, kind: input, shape index: {}]   ;;  %s1272_s2 = inlined_call_operand.hbm [shape: f32[1,256], index: 2, kind: input, shape index: {}]   ;;  %s1273_s3 = inlined_call_operand.hbm [shape: f32[52,128], index: 3, kind: output, shape index: {}]  }
   0x1   :  { %10 = vsyncpa [#allocation3 + $0x1], 0 }
   0x2   :  { %11 = vsyncpa [#allocation6], 0 }
   0x3   :  { %12 = vsyncpa [#allocation4], 0 }
   0x4   :  { %14 = vsyncpa [#allocation4 + $0x1], 0  ;;  %s1018_s12 = smov 0   ;;  %s1020_s13 = smov 0  }
   0x5   :  { %s1022_s14 = smov 0   ;;  %s1024_s15 = smov 0  }
   0x6 LB: > { %s1039_s16 = sadd.s32 4294967295, %s986_s15   ;;  %s596_s17 = sadd.s32 4294967294, %s986_s15   ;;  %s986_s15 = sphi %s1024_s15, %s1290_s15   ;;  %s982_s14 = sphi %s1022_s14, %s1289_s14   ;;  %s978_s13 = sphi %s1020_s13, %s1288_s13   ;;  %s974_s12 = sphi %s1018_s12, %s1287_s12  }
   0x7   : > { %s1043_s18 = sadd.s32 1, %s986_s15   ;;  %s27_s19 = sadd.s32 1, %s982_s14 }
   0x8   : > { %s24_s20 = ssub.s32 %s986_s15, %s1043_s18  ;;  %p34_p0 = scmp.ne.s32.totalorder %s982_s14, %s978_s13 }
   0x9   : > { %p25_p1 = scmp.eq.s32.totalorder %s24_s20, 0  ;;  %p35_p2 = scmp.eq.s32.totalorder %s986_s15, 0 }
   0xa   : > { %p40_p3 = scmp.ne.s32.totalorder %s978_s13, %s974_s12  ;;  %p1275_p4 = scmp.eq.s32.totalorder %s1039_s16, 0 }
   0xb   : > { %s1055_s21 = scalar_select %p25_p1, %s982_s14, %s27_s19  }
   0xc   : > { %p1057_p5 = por %p35_p2, %p34_p0  ;;  %p1063_p6 = por %p1275_p4, %p40_p3 }
   0xd   : > { %p106_p7 = scmp.eq.s32.totalorder %s1039_s16, 1  ;;  %p112_p8 = scmp.eq.s32.totalorder %s596_s17, 1 }
   0xe   : > { %p597_p9 = scmp.ge.s32.totalorder %s986_s15, 1  ;;  %p119_p10 = scmp.lt.s32.totalorder %s986_s15, 3 }
   0xf   : > { %p1070_p11 = por %p106_p7, %p34_p0  ;;  %p1074_p12 = por %p112_p8, %p40_p3 }
  0x10   : > { %p1078_p13 = pnand %p597_p9, %p119_p10  ;;  %s130_s29 = sshll.u32 %s1271_s1, 4  ;;  %s131_s29 = int_to_ptr.hbm [resolvable:$true] %s130_s29 }
  0x11   : > { %s1279_s25 = scalar_select %p1074_p12, 1, 0 }
  0x12   : > { %p734_p1 = pneg %p1078_p13  ;;  %s988_s30 = smov [#allocation5]  }
  0x13   : > { %s132_s4 = sshll.u32 %s988_s30, 4  ;;  %s145_s7 = sshll.u32 %s1272_s2, 4  ;;  %s133_s4 = int_to_ptr.vmem [resolvable:$true] %s132_s4  ;;  %s146_s7 = int_to_ptr.hbm [resolvable:$true] %s145_s7 }
  0x14   : > { %p735_p0 = pnand %p734_p1, %p1275_p4  ;;  %s989_s8 = smov 128  }
  0x15   : > { %s990_s9 = smov 8   ;;  %s991_s10 = smov [#allocation7]  }
  0x16   : > { %737 = dma.hbm_to_vmem [thread:$0]  (!%p735_p0), %s131_s29, 2048, %s133_s4, [#allocation6], %s989_s8, %s989_s8, %s990_s9  }
  0x17   : > { %s147_s11 = sshll.u32 %s991_s10, 4  ;;  %p1274_p2 = scmp.ge.s32.totalorder %s986_s15, 2  ;;  %s148_s11 = int_to_ptr.vmem [resolvable:$true] %s147_s11 }
  0x18   : > { %740 = dma.hbm_to_vmem [thread:$0]  (!%p735_p0), %s146_s7, 32, %s148_s11, [#allocation6]  }
  0x19   : > { %154 = sbr.rel (%p1274_p2) target bundleno = 66 (0x42), region = 24 }
  0x1e   : > { %157 = sbr.rel (!%p1057_p5) target bundleno = 66 (0x42), region = 28  ;;  %s158_s17 = sand.u32 (%p1057_p5), 1, %s982_s14  }
  0x1f   : > { %s602_s19 = sshll.u32 (%p1057_p5), %s986_s15, 2  ;;  %s601_s20 = sshll.u32 (%p1057_p5), %s158_s17, 5 }
  0x20   : > { %s164_s27 = ssub.s32 (%p1057_p5), 7, %s602_s19  ;;  %s1102_s4 = scalar_lea.sflag (%p1057_p5), [#allocation3], %s158_s17 }
  0x21   : > { %p165_p3 = scmp.lt.s32.totalorder (%p1057_p5), %s164_s27, 4  ;;  %s162_s5 = scalar_lea.vmem (%p1057_p5), [#allocation2], %s601_s20 }
  0x23   : > { %s1292_s27 = smov (!%p165_p3, %s164_s27), 4 }
  0x24   : > { %s603_s28 = sshll.u32 %s1292_s27, 3 }
  0x25   : > { %s168_s29 = ssub.s32 32, %s603_s28 }
  0x26   : > { %s169_s30 = sshll.u32 %s168_s29, 4 }
  0x27   : > { %170 = vsyncadd %s1102_s4, %s169_s30  ;;  %p1105_p5 = scmp.ne.s32.totalorder %s603_s28, 0  ;;  %s690_s6 = sshll.u32 %s986_s15, 5 }
  0x28   : > { %s173_s9 = scalar_lea.hbm %s1270_s0, %s690_s6  ;;  %s1113_s10 = sshll.u32 %s162_s5, 4  ;;  %s178_s10 = int_to_ptr.vmem [resolvable:$true] %s1113_s10 }
  0x29   : > { %s175_s11 = sshll.u32 %s173_s9, 4  ;;  %s607_s17 = sshll.u32 %s1292_s27, 7  ;;  %s1116_s11 = int_to_ptr.hbm [resolvable:$true] %s175_s11 }
  0x2a   : > { %s866_s19 = sshra.s32 %s1116_s11, 4  ;;  %s868_s20 = sshrl.u32 %s607_s17, 4  ;;  %s867_s19 = int_to_ptr.hbm [resolvable:$true] %s866_s19 }
  0x2b   : > { %s873_s28 = scalar_lea.hbm %s867_s19, %s868_s20  ;;  %s877_s5 = scalar_lea.hbm %s1270_s0, 56 }
  0x2c   : > { %p874_p7 = scmp.ne.s32.totalorder %s867_s19, %s873_s28  ;;  %p878_p10 = scmp.lt.s32.totalorder %s867_s19, %s1270_s0 }
  0x2d   : > { %p879_p1 = scmp.lt.s32.totalorder %s877_s5, %s873_s28 }
  0x2e   : > { %p875_p8 = pnand %p874_p7, %p1105_p5 }
  0x2f   : > { %p880_p0 = por %p879_p1, %p878_p10 }
  0x30   : > { %p876_p9 = pneg %p875_p8 }
  0x32   : > { %p881_p3 = pnand %p880_p0, %p876_p9 }
  0x34   : > { %884 = shalt.err (!%p881_p3)
}
  0x35   : > { %s885_s8 = sshra.s32 %s178_s10, 4  ;;  %s992_s29 = smov [#allocation2]   ;;  %s886_s8 = int_to_ptr.vmem [resolvable:$true] %s885_s8 }
  0x36   : > { %s892_s9 = scalar_lea.vmem %s886_s8, %s868_s20  ;;  %s896_s30 = scalar_lea.vmem %s992_s29, 64 }
  0x37   : > { %p893_p7 = scmp.ne.s32.totalorder %s886_s8, %s892_s9  ;;  %p898_p4 = scmp.lt.s32.totalorder %s896_s30, %s892_s9 }
  0x39   : > { %p894_p8 = pnand %p893_p7, %p1105_p5 }
  0x3b   : > { %p895_p2 = pneg %p894_p8 }
  0x3d   : > { %p900_p12 = pnand %p898_p4, %p895_p2 }
  0x3f   : > { %903 = shalt.err (!%p900_p12)
}
  0x40   : > { %s993_s19 = smov 128   ;;  %s994_s28 = smov 8  }
  0x41   : > { %183 = dma.hbm_to_vmem [thread:$0]  (%p1105_p5), %s1116_s11, %s607_s17, %s178_s10, %s1102_s4, %s993_s19, %s993_s19, %s994_s28  }
  0x42 PF: > { %189 = sbr.rel (%p1078_p13) target bundleno = 315 (0x13b), region = 32  ;;  %s1145_s20 = sand.u32 (!%p1078_p13), 1, %s978_s13  }
  0x43   : > { %s609_s5 = sshll.u32 (!%p1078_p13), %s1145_s20, 5  ;;  %s192_s6 = scalar_lea.sflag (!%p1078_p13), [#allocation3], %s1145_s20 }
  0x44   : > { %s1151_s7 = scalar_lea.vmem (!%p1078_p13), [#allocation2], %s609_s5 }
  0x47   : > { %961 = dma.done.wait (%p1063_p6), %s192_s6, 512  }
  0x48   : > { %963 = vsyncadd (%p1063_p6), %s192_s6, 4294966784  ;;  %p1282_p4 = scmp.eq.s32.totalorder %s1039_s16, 0 }
  0x4a   : > { %965 = dma.done.wait (%p1282_p4), [#allocation6], 2080   ;;  %p1283_p12 = pmov %p1282_p4 }
  0x4b   : > { %v705_v0 = vld [vmem:[#allocation5 + $0x74] sm:$0xf]  ;;  %v673_v1 = vld [vmem:[#allocation5 + $0x78] sm:$0xf0]  ;;  %v703_v2 = vld [vmem:[#allocation5 + $0x64] sm:$0xf] }
  0x4c   : > { %967 = vsyncadd (%p1283_p12), [#allocation6], 4294965216  ;;  %v676_v3 = vor.u32 %v705_v0, %v673_v1  ;;  %v665_v4 = vld [vmem:[#allocation5 + $0x68] sm:$0xf0]  ;;  %v671_v5 = vld [vmem:[#allocation5 + $0x70] sm:$0xf] }
  0x4d   : > { %v668_v6 = vor.u32 %v703_v2, %v665_v4  ;;  %v701_v7 = vld [vmem:[#allocation5 + $0x54] sm:$0xf]  ;;  %v706_v8 = vld [vmem:[#allocation5 + $0x74] sm:$0xf0]  ;;  %v657_v9 = vld [vmem:[#allocation5 + $0x58] sm:$0xf0] }
  0x4e   : > { %366 = vmatpush.bf16.msra.mxu1 %v676_v3  ;;  %716 = vmatpush.bf16.msra.mxu3 %v676_v3  ;;  %v672_v10 = vor.u32 %v706_v8, %v671_v5  ;;  %v663_v11 = vld [vmem:[#allocation5 + $0x60] sm:$0xf]  ;;  %v704_v12 = vld [vmem:[#allocation5 + $0x64] sm:$0xf0]  ;;  %v660_v14 = vor.u32 %v701_v7, %v657_v9  ;;  %v655_v15 = vld [vmem:[#allocation5 + $0x50] sm:$0xf] }
  0x4f   : > { %v664_v13 = vor.u32 %v704_v12, %v663_v11  ;;  %v702_v16 = vld [vmem:[#allocation5 + $0x54] sm:$0xf0]  ;;  %v699_v17 = vld [vmem:[#allocation5 + $0x44] sm:$0xf]  ;;  %v649_v18 = vld [vmem:[#allocation5 + $0x48] sm:$0xf0] }
  0x50   : > { %708 = vmatpush.bf16.msra.mxu2 %v672_v10  ;;  %347 = vmatpush.bf16.msra.mxu0 %v672_v10  ;;  %v656_v19 = vor.u32 %v702_v16, %v655_v15  ;;  %v652_v20 = vor.u32 %v699_v17, %v649_v18  ;;  %v647_v21 = vld [vmem:[#allocation5 + $0x40] sm:$0xf]  ;;  %v700_v22 = vld [vmem:[#allocation5 + $0x44] sm:$0xf0]  ;;  %v697_v23 = vld [vmem:[#allocation5 + $0x34] sm:$0xf] }
  0x51   : > { %v641_v24 = vld [vmem:[#allocation5 + $0x38] sm:$0xf0]  ;;  %v648_v25 = vor.u32 %v700_v22, %v647_v21  ;;  %v639_v27 = vld [vmem:[#allocation5 + $0x30] sm:$0xf]  ;;  %v698_v28 = vld [vmem:[#allocation5 + $0x34] sm:$0xf0] }
  0x52   : > { %367 = vmatpush.bf16.msra.mxu1 %v668_v6  ;;  %717 = vmatpush.bf16.msra.mxu3 %v668_v6  ;;  %v644_v26 = vor.u32 %v697_v23, %v641_v24  ;;  %v695_v29 = vld [vmem:[#allocation5 + $0x24] sm:$0xf]  ;;  %v633_v30 = vld [vmem:[#allocation5 + $0x28] sm:$0xf0]  ;;  %v640_v31 = vor.u32 %v698_v28, %v639_v27  ;;  %v631_v33 = vld [vmem:[#allocation5 + $0x20] sm:$0xf] }
  0x53   : > { %v636_v32 = vor.u32 %v695_v29, %v633_v30  ;;  %v696_v34 = vld [vmem:[#allocation5 + $0x24] sm:$0xf0]  ;;  %v693_v35 = vld [vmem:[#allocation5 + $0x14] sm:$0xf]  ;;  %v625_v36 = vld [vmem:[#allocation5 + $0x18] sm:$0xf0] }
  0x54   : > { %709 = vmatpush.bf16.msra.mxu2 %v664_v13  ;;  %348 = vmatpush.bf16.msra.mxu0 %v664_v13  ;;  %v632_v37 = vor.u32 %v696_v34, %v631_v33  ;;  %v628_v38 = vor.u32 %v693_v35, %v625_v36  ;;  %v623_v39 = vld [vmem:[#allocation5 + $0x10] sm:$0xf]  ;;  %v694_v40 = vld [vmem:[#allocation5 + $0x14] sm:$0xf0]  ;;  %v691_v41 = vld [vmem:[#allocation5 + $0x4] sm:$0xf] }
  0x55   : > { %v617_v42 = vld [vmem:[#allocation5 + $0x8] sm:$0xf0]  ;;  %v1162_v43 = vld [vmem:[%s1151_s7] sm:$0xff]  ;;  %v624_v44 = vor.u32 %v694_v40, %v623_v39  ;;  %v1168_v47 = vld [vmem:[%s1151_s7 + $0x10] sm:$0xff]  ;;  %s1192_s23 = scalar_lea.vmem [#allocation8], %s609_s5  ;;  %s482_s26 = scalar_lea.sflag [#allocation4], %s1145_s20 }
  0x56   : > { %368 = vmatpush.bf16.msra.mxu1 %v660_v14  ;;  %718 = vmatpush.bf16.msra.mxu3 %v660_v14  ;;  %v620_v45 = vor.u32 %v691_v41, %v617_v42  ;;  %v1165_v46 = vld [vmem:[%s1151_s7 + $0x8] sm:$0xff]  ;;  %v1171_v48 = vld [vmem:[%s1151_s7 + $0x18] sm:$0xff]  ;;  %v615_v49 = vld [vmem:[#allocation5] sm:$0xf]  ;;  %s682_s27 = sshll.u32 (%p1070_p11), %s1039_s16, 2 }
  0x57   : > { %v692_v50 = vld [vmem:[#allocation5 + $0x4] sm:$0xf0]  ;;  %v243_v51 = vpack.c.bf16 %v1165_v46, %v1162_v43  ;;  %v244_v52 = vpack.c.bf16 %v1171_v48, %v1168_v47  ;;  %v261_v54 = vld [vmem:[#allocation7] sm:$0x3]  ;;  %s490_s4 = ssub.s32 (%p1070_p11), 7, %s682_s27 }
  0x58   : > { %710 = vmatpush.bf16.msra.mxu2 %v656_v19  ;;  %349 = vmatpush.bf16.msra.mxu0 %v656_v19  ;;  %v616_v53 = vor.u32 %v692_v50, %v615_v49  ;;  %v264_v55 = vperm.slane %v261_v54, 1  ;;  %v263_v5 = vperm.slane %v261_v54, 0  ;;  %p491_p6 = scmp.lt.s32.totalorder (%p1070_p11), %s490_s4, 4 }
  0x5a   : > { %369 = vmatpush.bf16.msra.mxu1 %v652_v20  ;;  %719 = vmatpush.bf16.msra.mxu3 %v652_v20 }
  0x5c   : > { %711 = vmatpush.bf16.msra.mxu2 %v648_v25  ;;  %350 = vmatpush.bf16.msra.mxu0 %v648_v25 }
  0x5e   : > { %370 = vmatpush.bf16.msra.mxu1 %v644_v26  ;;  %720 = vmatpush.bf16.msra.mxu3 %v644_v26 }
  0x60   : > { %712 = vmatpush.bf16.msra.mxu2 %v640_v31  ;;  %351 = vmatpush.bf16.msra.mxu0 %v640_v31 }
  0x62   : > { %371 = vmatpush.bf16.msra.mxu1 %v636_v32  ;;  %721 = vmatpush.bf16.msra.mxu3 %v636_v32 }
  0x64   : > { %713 = vmatpush.bf16.msra.mxu2 %v632_v37  ;;  %352 = vmatpush.bf16.msra.mxu0 %v632_v37 }
  0x66   : > { %372 = vmatpush.bf16.msra.mxu1 %v628_v38  ;;  %722 = vmatpush.bf16.msra.mxu3 %v628_v38 }
  0x68   : > { %714 = vmatpush.bf16.msra.mxu2 %v624_v44  ;;  %353 = vmatpush.bf16.msra.mxu0 %v624_v44 }
  0x6a   : > { %373 = vmatpush.bf16.msra.mxu1 %v620_v45  ;;  %723 = vmatpush.bf16.msra.mxu3 %v620_v45 }
  0x6c   : > { %715 = vmatpush.bf16.msra.mxu2 %v616_v53  ;;  %354 = vmatpush.bf16.msra.mxu0 %v616_v53 }
  0x6d   : > { %374 = vmatmul.bf16.vlgmr.msra.gmra.mxu1 %v243_v51  ;;  %379 = vmatmul.bf16.vlgmr.msra.gmra.mxu3 %v244_v52 }
  0x6f   : > { %360 = vmatmul.bf16.vlgmr.msra.gmra.mxu2 %v244_v52  ;;  %355 = vmatmul.bf16.vlgmr.msra.gmra.mxu0 %v243_v51 }
  0xea   : > { %v375_v56 = vpop.f32.mrf.mxu1 }
  0xeb   : > { %v376_v57 = vadd.f32 %v375_v56, %v264_v55 }
  0xec   : > { %v356_v6 = vpop.f32.mrf.mxu0 }
  0xed   : > { %v677_v58 = vmul.f32 -1.442695, %v376_v57  ;;  %v357_v11 = vadd.f32 %v356_v6, %v263_v5 }
  0xef   : > { %790 = vpow2.f32 %v677_v58  ;;  %v385_v18 = vmax.f32 %v357_v11, 0.0 }
  0xf0   : > { %v380_v59 = vpop.f32.mrf.mxu3 }
  0xf1   : > { %v381_v60 = vadd.f32 %v380_v59, %v264_v55  ;;  %v465_v29 = vsub.f32 %v385_v18, %v1162_v43 }
  0xf2   : > { %v377_v61 = vpop.f32.mrf.mxu1  ;;  %v361_v15 = vpop.f32.mrf.mxu2 }
  0xf3   : > { %v679_v62 = vmul.f32 -1.442695, %v381_v60  ;;  %v378_v63 = vadd.f32 %v377_v61, %v264_v55  ;;  %v362_v16 = vadd.f32 %v361_v15, %v263_v5 }
  0xf4   : > { %v358_v23 = vpop.f32.mrf.mxu0 }
  0xf5   : > { %v791_v0 = vpop.eup %790  ;;  %792 = vpow2.f32 %v679_v62  ;;  %v678_v1 = vmul.f32 -1.442695, %v378_v63  ;;  %v387_v26 = vmax.f32 %v362_v16, 0.0  ;;  %v359_v32 = vadd.f32 %v358_v23, %v263_v5 }
  0xf6   : > { %v401_v2 = vadd.f32 1.0, %v791_v0 }
  0xf7   : > { %794 = vpow2.f32 %v678_v1  ;;  %v467_v39 = vsub.f32 %v387_v26, %v1168_v47  ;;  %v386_v45 = vmax.f32 %v359_v32, 0.0 }
  0xf8   : > { %796 = vrcp.f32 %v401_v2  ;;  %v382_v3 = vpop.f32.mrf.mxu3  ;;  %v416_v19 = vand.u32 2147483648, %v401_v2  ;;  %vm410_vm0 = vweird.f32 %v401_v2  ;;  %v414_v22 = vand.u32 2147483647, %v401_v2 }
  0xf9   : > { %v383_v4 = vadd.f32 %v382_v3, %v264_v55  ;;  %v466_v61 = vsub.f32 %v386_v45, %v1165_v46 }
  0xfa   : > { %v417_v31 = vor.u32 1.1754944e-38, %v416_v19  ;;  %vm415_vm3 = vcmp.eq.f32.partialorder %v414_v22, 8.507059e+37  ;;  %v363_v44 = vpop.f32.mrf.mxu2 }
  0xfb   : > { %v793_v7 = vpop.eup %792  ;;  %v680_v8 = vmul.f32 -1.442695, %v383_v4  ;;  %v364_v56 = vadd.f32 %v363_v44, %v263_v5 }
  0xfc   : > { %v403_v9 = vadd.f32 1.0, %v793_v7 }
  0xfd   : > { %v795_v10 = vpop.eup %794  ;;  %798 = vpow2.f32 %v680_v8 }
  0xfe   : > { %v797_v12 = vpop.eup %796  ;;  %800 = vrcp.f32 %v403_v9  ;;  %v1177_v13 = vadd.f32 1.0, %v795_v10  ;;  %v444_v37 = vand.u32 2147483647, %v403_v9  ;;  %v446_v38 = vand.u32 2147483648, %v403_v9 }
  0xff   : > { %v406_v14 = vmul.f32 %v797_v12, %v401_v2  ;;  %vm411_vm1 = vweird.f32 %v797_v12  ;;  %vm440_vm5 = vweird.f32 %v403_v9  ;;  %v388_v2 = vmax.f32 %v364_v56, 0.0 }
 0x100   : > { %802 = vrcp.f32 %v1177_v13  ;;  %vm412_vm2 = vmor %vm410_vm0, %vm411_vm1  ;;  %v429_v49 = vand.u32 2147483647, %v1177_v13  ;;  %v431_v50 = vand.u32 2147483648, %v1177_v13  ;;  %vm445_vm8 = vcmp.eq.f32.partialorder %v444_v37, 8.507059e+37 }
 0x101   : > { %v407_v17 = vsub.f32 1.0, %v406_v14  ;;  %v447_v55 = vor.u32 1.1754944e-38, %v446_v38  ;;  %vm425_vm9 = vweird.f32 %v1177_v13 }
 0x102   : > { %v432_v60 = vor.u32 1.1754944e-38, %v431_v50  ;;  %vm430_vm11 = vcmp.eq.f32.partialorder %v429_v49, 8.507059e+37 }
 0x103   : > { %v799_v20 = vpop.eup %798  ;;  %v408_v21 = vmul.f32 %v797_v12, %v407_v17 }
 0x104   : > { %v801_v24 = vpop.eup %800  ;;  %v1180_v25 = vadd.f32 1.0, %v799_v20 }
 0x105   : > { %v436_v27 = vmul.f32 %v801_v24, %v403_v9  ;;  %v409_v28 = vadd.f32 %v797_v12, %v408_v21  ;;  %vm441_vm4 = vweird.f32 %v801_v24 }
 0x106   : > { %v803_v30 = vpop.eup %802  ;;  %804 = vrcp.f32 %v1180_v25  ;;  %vm442_vm7 = vmor %vm440_vm5, %vm441_vm4  ;;  %v459_v3 = vand.u32 2147483647, %v1180_v25  ;;  %v461_v4 = vand.u32 2147483648, %v1180_v25  ;;  %vm455_vm13 = vweird.f32 %v1180_v25 }
 0x107   : > { %v437_v33 = vsub.f32 1.0, %v436_v27  ;;  %v421_v34 = vmul.f32 %v803_v30, %v1177_v13  ;;  %v413_v35 = vsel %vm412_vm2, %v797_v12, %v409_v28  ;;  %vm426_vm6 = vweird.f32 %v803_v30 }
 0x108   : > { %v418_v36 = vsel %vm415_vm3, %v417_v31, %v413_v35  ;;  %vm427_vm10 = vmor %vm425_vm9, %vm426_vm6  ;;  %v462_v10 = vor.u32 1.1754944e-38, %v461_v4  ;;  %vm460_vm15 = vcmp.eq.f32.partialorder %v459_v3, 8.507059e+37  ;;  %v468_v12 = vsub.f32 %v388_v2, %v1171_v48 }
 0x109   : > { %v422_v40 = vsub.f32 1.0, %v421_v34  ;;  %v469_v41 = vmul.f32 %v465_v29, %v418_v36  ;;  %v438_v42 = vmul.f32 %v801_v24, %v437_v33 }
 0x10b   : > { %v473_v51 = vadd.f32 %v469_v41, %v1162_v43  ;;  %v439_v52 = vadd.f32 %v801_v24, %v438_v42  ;;  %v423_v53 = vmul.f32 %v803_v30, %v422_v40 }
 0x10c   : > { %v805_v54 = vpop.eup %804 }
 0x10d   : > { %v451_v57 = vmul.f32 %v805_v54, %v1180_v25  ;;  %477 = vst [vmem:[%s1192_s23] sm:$0xff] %v473_v51  ;;  %v443_v58 = vsel %vm442_vm7, %v801_v24, %v439_v52  ;;  %v424_v59 = vadd.f32 %v803_v30, %v423_v53  ;;  %vm456_vm12 = vweird.f32 %v805_v54 }
 0x10e   : > { %v448_v43 = vsel %vm445_vm8, %v447_v55, %v443_v58  ;;  %vm457_vm14 = vmor %vm455_vm13, %vm456_vm12 }
 0x10f   : > { %v452_v62 = vsub.f32 1.0, %v451_v57  ;;  %v471_v63 = vmul.f32 %v467_v39, %v448_v43  ;;  %v428_v0 = vsel %vm427_vm10, %v803_v30, %v424_v59 }
 0x110   : > { %v433_v1 = vsel %vm430_vm11, %v432_v60, %v428_v0 }
 0x111   : > { %v475_v5 = vadd.f32 %v471_v63, %v1168_v47  ;;  %v470_v6 = vmul.f32 %v466_v61, %v433_v1  ;;  %v453_v7 = vmul.f32 %v805_v54, %v452_v62 }
 0x113   : > { %479 = vst [vmem:[%s1192_s23 + $0x10] sm:$0xff] %v475_v5  ;;  %v474_v8 = vadd.f32 %v470_v6, %v1165_v46  ;;  %v454_v9 = vadd.f32 %v805_v54, %v453_v7 }
 0x115   : > { %478 = vst [vmem:[%s1192_s23 + $0x8] sm:$0xff] %v474_v8  ;;  %v458_v11 = vsel %vm457_vm14, %v805_v54, %v454_v9 }
 0x116   : > { %v463_v13 = vsel %vm460_vm15, %v462_v10, %v458_v11 }
 0x117   : > { %v472_v47 = vmul.f32 %v468_v12, %v463_v13  ;;  %488 = sbr.rel (!%p1070_p11) target bundleno = 315 (0x13b), region = 48 }
 0x119   : > { %v476_v14 = vadd.f32 %v472_v47, %v1171_v48 }
 0x11b   : > { %480 = vst [vmem:[%s1192_s23 + $0x18] sm:$0xff] %v476_v14 }
 0x11c   : > { %s1294_s4 = smov (!%p491_p6, %s490_s4), 4 }
 0x11d   : > { %s683_s22 = sshll.u32 %s1294_s4, 3 }
 0x11e   : > { %s494_s10 = ssub.s32 32, %s683_s22 }
 0x11f   : > { %s495_s11 = sshll.u32 %s494_s10, 4 }
 0x120   : > { %496 = vsyncadd %s482_s26, %s495_s11  ;;  %p1216_p13 = scmp.ne.s32.totalorder %s683_s22, 0  ;;  %s707_s17 = sshll.u32 %s1039_s16, 5 }
 0x121   : > { %s499_s29 = scalar_lea.hbm %s1273_s3, %s707_s17  ;;  %s501_s30 = sshll.u32 %s1192_s23, 4  ;;  %s1225_s30 = int_to_ptr.vmem [resolvable:$true] %s501_s30 }
 0x122   : > { %s503_s19 = sshll.u32 %s499_s29, 4  ;;  %s687_s28 = sshll.u32 %s1294_s4, 7  ;;  %s1227_s19 = int_to_ptr.hbm [resolvable:$true] %s503_s19 }
 0x123   : > { %s905_s5 = sshra.s32 %s1225_s30, 4  ;;  %s907_s6 = sshrl.u32 %s687_s28, 4  ;;  %s906_s5 = int_to_ptr.vmem [resolvable:$true] %s905_s5 }
 0x124   : > { %s912_s7 = scalar_lea.vmem %s906_s5, %s907_s6  ;;  %s995_s16 = smov [#allocation8]  }
 0x125   : > { %p913_p11 = scmp.ne.s32.totalorder %s906_s5, %s912_s7  ;;  %s916_s27 = scalar_lea.vmem %s995_s16, 64 }
 0x126   : > { %p918_p9 = scmp.lt.s32.totalorder %s916_s27, %s912_s7 }
 0x127   : > { %p914_p2 = pnand %p913_p11, %p1216_p13 }
 0x129   : > { %p915_p5 = pneg %p914_p2 }
 0x12b   : > { %p920_p10 = pnand %p918_p9, %p915_p5 }
 0x12d   : > { %923 = shalt.err (!%p920_p10)
}
 0x12e   : > { %s924_s23 = sshra.s32 %s1227_s19, 4  ;;  %s935_s17 = scalar_lea.hbm %s1273_s3, 56  ;;  %s925_s23 = int_to_ptr.hbm [resolvable:$true] %s924_s23 }
 0x12f   : > { %s931_s22 = scalar_lea.hbm %s925_s23, %s907_s6  ;;  %p936_p7 = scmp.lt.s32.totalorder %s925_s23, %s1273_s3 }
 0x130   : > { %p932_p1 = scmp.ne.s32.totalorder %s925_s23, %s931_s22  ;;  %p937_p8 = scmp.lt.s32.totalorder %s935_s17, %s931_s22 }
 0x132   : > { %p933_p0 = pnand %p932_p1, %p1216_p13  ;;  %p938_p4 = por %p937_p8, %p936_p7 }
 0x134   : > { %p934_p3 = pneg %p933_p0 }
 0x136   : > { %p939_p12 = pnand %p938_p4, %p934_p3 }
 0x138   : > { %942 = shalt.err (!%p939_p12)
}
 0x139   : > { %s996_s29 = smov 128   ;;  %s997_s5 = smov 8  }
 0x13a   : > { %509 = dma.vmem_to_hbm [thread:$0]  (%p1216_p13), %s1225_s30, %s687_s28, %s1227_s19, %s482_s26, %s996_s29, %s996_s29, %s997_s5  }
 0x13b PF: > { %s518_s6 = sand.u32 1, %s974_s12   ;;  %p1285_p6 = scmp.ne.s32.totalorder %s1279_s25, 0 }
 0x13c   : > { %p1286_p11 = scmp.ge.s32.totalorder %s986_s15, 2  ;;  %s519_s7 = scalar_lea.sflag [#allocation4], %s518_s6 }
 0x13e   : > { %p742_p2 = pnand %p1286_p11, %p1285_p6 }
 0x140   : > { %p743_p5 = pneg %p742_p2 }
 0x142   : > { %969 = dma.done.wait (%p743_p5), %s519_s7, 512  }
 0x143   : > { %971 = vsyncadd (%p743_p5), %s519_s7, 4294966784  ;;  %p17_p9 = scmp.ge.s32.totalorder %s1043_s18, 4   ;;  %s1287_s12 = smov %s978_s13 }
 0x144   : > { %s1288_s13 = smov %s982_s14  ;;  %s1289_s14 = smov %s1055_s21 }
 0x145   : > { %s1290_s15 = smov %s1043_s18  ;;  %19 = sbr.rel (!%p17_p9) target bundleno = 6 (0x6), region = 85 }
 0x14a   :  { %525 = vsyncpa [#allocation3], 1 }
 0x14b   :  { %527 = vsyncpa [#allocation3 + $0x1], 1 }
 0x14c   :  { %528 = vsyncpa [#allocation6], 1 }
 0x14d   :  { %529 = vsyncpa [#allocation4], 1 }
 0x14e   :  { %531 = vsyncpa [#allocation4 + $0x1], 1 }

</bundles_post_ra>
